<compile_context>
chip_gen: v6e
topology: v6e:2x2x1
jax: 0.10.0
libtpu: 0.0.40
codegen_flags: <defaults>
</compile_context>

<pallas_src>
import numpy as np
import jax
import jax.numpy as jnp
from jax.experimental import pallas as pl
from jax.experimental.pallas import tpu as pltpu


def _alpaca_kernel(x_ref, w1_ref, b1_ref, w2_ref, b2_ref, w3_ref, b3_ref,
                   w4_ref, b4_ref, lt_ref, tile_ref, ql_ref, sel_ref, out_ref):
    f32 = jnp.float32
    # ---- encoder MLP: Linear -> tanh -> Linear -> tanh -> Linear -> tanh -> Linear ----
    x = x_ref[...]
    h = jnp.tanh(jnp.dot(x, w1_ref[...], preferred_element_type=f32) + b1_ref[...])
    h = jnp.tanh(jnp.dot(h, w2_ref[...], preferred_element_type=f32) + b2_ref[...])
    h = jnp.tanh(jnp.dot(h, w3_ref[...], preferred_element_type=f32) + b3_ref[...])
    phi = jnp.dot(h, w4_ref[...], preferred_element_type=f32) + b4_ref[...]           # (TB, P)

    # lphi[b, k*P + r]  = (L[k] @ phi[b])[r]      -- one matmul over all (z,u) pairs
    lphi = jnp.dot(phi, lt_ref[...], preferred_element_type=f32)                      # (TB, ZU*P)
    # phi_rep[b, k*P+r] = phi[b, r]               -- lane tiling done on the MXU (layout-safe)
    phi_rep = jnp.dot(phi, tile_ref[...], preferred_element_type=f32)                 # (TB, ZU*P)
    # out[:, :ZU] = mu = phi @ (Q L)^T ;  out[:, ZU:] = phi^T L phi  (sigfactor-1, +1 in wrapper)
    mu_part = jnp.dot(phi, ql_ref[...], preferred_element_type=f32)                   # (TB, 2*ZU)
    quad_part = jnp.dot(lphi * phi_rep, sel_ref[...], preferred_element_type=f32)     # (TB, 2*ZU)
    out_ref[...] = mu_part + quad_part                                                # single store


def _round_up(a, m):
    return (a + m - 1) // m * m


def alpaca_forward(x, posterior_params, enc_params, log_sig_eps, *, batch_tile=128):
    """Equivalent of AlpacaImitation.forward(x, posterior_params) -> (mu, sig)."""
    Q, L = posterior_params                         # (z, u, 1, P), (z, u, P, P)
    z_dim, u_dim, _, P = Q.shape
    ZU = z_dim * u_dim
    NO = 2 * ZU

    B = x.shape[0]
    x2 = x.reshape(B, -1).astype(jnp.float32)       # drop the singleton broadcast dim
    x_dim = x2.shape[1]

    # --- wrapper-side repacking of posterior params (parameter-only, no data dependence) ---
    Qr = Q.reshape(ZU, P).astype(jnp.float32)
    Lr = L.reshape(ZU, P, P).astype(jnp.float32)
    # LT_big[p, k*P + r] = L[k][r, p]   ->  (phi @ LT_big)[b, k*P + r] = (L[k] @ phi[b])[r]
    LT_big = jnp.transpose(Lr, (2, 0, 1)).reshape(P, ZU * P)
    # QL[p, k] = (Q[k] @ L[k])[p]       ->  mu[b, k] = (phi @ QL)[b, k]
    QL = jnp.einsum('kq,kqp->pk', Qr, Lr)
    QL_pad = jnp.concatenate([QL, jnp.zeros((P, ZU), jnp.float32)], axis=1)            # (P, 2*ZU)
    # TILE[r, k*P + r] = 1 (lane tiling of phi);  SEL_pad[k*P + r, ZU + k] = 1 (block-sum selector)
    TILE = jnp.asarray(np.tile(np.eye(P, dtype=np.float32), (1, ZU)))                  # (P, ZU*P)
    sel_np = np.kron(np.eye(ZU, dtype=np.float32), np.ones((P, 1), dtype=np.float32))  # (ZU*P, ZU)
    SEL_pad = jnp.asarray(
        np.concatenate([np.zeros((ZU * P, ZU), np.float32), sel_np], axis=1))          # (ZU*P, 2*ZU)

    (w1, b1), (w2, b2), (w3, b3), (w4, b4) = [
        (w.astype(jnp.float32), b.astype(jnp.float32).reshape(1, -1)) for (w, b) in enc_params
    ]

    # --- batch tiling: pad B to the 8-row sublane tile and grid over it ---
    TB = min(batch_tile, _round_up(B, 8))
    B_pad = _round_up(B, TB)
    if B_pad != B:
        x2 = jnp.concatenate([x2, jnp.zeros((B_pad - B, x_dim), jnp.float32)], axis=0)
    grid = (B_pad // TB,)

    def _batched(i):
        return (i, 0)

    def _const(i):
        return (0, 0)

    def _full(a):
        return pl.BlockSpec(a.shape, _const)       # whole array resident across grid steps

    out_flat = pl.pallas_call(
        _alpaca_kernel,
        grid=grid,
        in_specs=[
            pl.BlockSpec((TB, x_dim), _batched),
            _full(w1), _full(b1), _full(w2), _full(b2), _full(w3), _full(b3),
            _full(w4), _full(b4),
            _full(LT_big), _full(TILE), _full(QL_pad), _full(SEL_pad),
        ],
        out_specs=pl.BlockSpec((TB, NO), _batched),
        out_shape=jax.ShapeDtypeStruct((B_pad, NO), jnp.float32),
        compiler_params=pltpu.CompilerParams(dimension_semantics=("parallel",)),
    )(x2, w1, b1, w2, b2, w3, b3, w4, b4, LT_big, TILE, QL_pad, SEL_pad)

    out_flat = out_flat[:B]
    mu = out_flat[:, :ZU].reshape(B, z_dim, u_dim, 1)
    sigfactor = 1.0 + out_flat[:, ZU:].reshape(B, z_dim, u_dim)
    SigEps = jnp.diag(jnp.exp(log_sig_eps))         # (u, u) diagonal
    sig = SigEps * sigfactor[..., None]             # (B, z, u, u)
    return mu, sig


if __name__ == "__main__":
    # small shapes consistent with the module's config
    x_dim, u_dim, z_dim = 8, 2, 3
    hid, P = 32, 32            # model.hidden_dim / model.phi_dim
    B = 8                      # fills the 8-row sublane tile (amortizes per-call overhead)

    key = jax.random.PRNGKey(0)
    ks = jax.random.split(key, 8)

    def lin(k, fan_in, fan_out):
        kw, kb = jax.random.split(k)
        bound = 1.0 / np.sqrt(fan_in)
        w = jax.random.uniform(kw, (fan_in, fan_out), jnp.float32, -bound, bound)
        b = jax.random.uniform(kb, (1, fan_out), jnp.float32, -bound, bound)
        return w, b

    enc_params = (lin(ks[0], x_dim, hid), lin(ks[1], hid, hid),
                  lin(ks[2], hid, hid), lin(ks[3], hid, P))

    # logSigEps with config 'model.sigma_eps': [0.1] -> length u_dim
    # TODO(synk): with the base config ([0.1]*4) SigEps is (4u,4u) and the torch broadcast
    # SigEps * sigfactor[..., None] would not line up; we use the [0.1] override so it does.
    log_sig_eps = jnp.log(jnp.full((u_dim,), 0.1, dtype=jnp.float32))

    # Q, L_asym, L_base parameters (same shapes / init scales as the module)
    Qp = jax.random.normal(ks[4], (u_dim, 1, P), jnp.float32) * 4.0 / (np.sqrt(P) + np.sqrt(u_dim))
    L_asym = jax.random.normal(ks[5], (u_dim, P, P), jnp.float32) / (P ** 2)
    L_base = jnp.tile(jnp.linspace(-5.0, 0.0, P, dtype=jnp.float32)[None, :], (u_dim, 1))

    # L property: L_asym @ L_asym^T + diag(exp(L_base))   (parameter setup = glue in JAX)
    Lmat = jnp.einsum('uij,ukj->uik', L_asym, L_asym) + jax.vmap(jnp.diag)(jnp.exp(L_base))

    # prior_params(): repeat over z_dim
    Q_post = jnp.broadcast_to(Qp[None], (z_dim, u_dim, 1, P))
    L_post = jnp.broadcast_to(Lmat[None], (z_dim, u_dim, P, P))

    x = jax.random.normal(ks[6], (B, 1, x_dim), jnp.float32)

    mu, sig = alpaca_forward(x, (Q_post, L_post), enc_params, log_sig_eps)
    jax.block_until_ready((mu, sig))

    assert mu.shape == (B, z_dim, u_dim, 1)
    assert sig.shape == (B, z_dim, u_dim, u_dim)
    assert mu.dtype == jnp.float32 and sig.dtype == jnp.float32
    assert bool(jnp.all(jnp.isfinite(mu))) and bool(jnp.all(jnp.isfinite(sig)))
    print("KERNEL_OK")
</pallas_src>

<mosaic_0001>
module attributes {stable_mosaic.version = 11 : i64} {
  func.func @_alpaca_kernel(%arg0: i32, %arg1: memref<8x8xf32, #tpu.memory_space<vmem>>, %arg2: memref<8x32xf32, #tpu.memory_space<vmem>>, %arg3: memref<1x32xf32, #tpu.memory_space<vmem>>, %arg4: memref<32x32xf32, #tpu.memory_space<vmem>>, %arg5: memref<1x32xf32, #tpu.memory_space<vmem>>, %arg6: memref<32x32xf32, #tpu.memory_space<vmem>>, %arg7: memref<1x32xf32, #tpu.memory_space<vmem>>, %arg8: memref<32x32xf32, #tpu.memory_space<vmem>>, %arg9: memref<1x32xf32, #tpu.memory_space<vmem>>, %arg10: memref<32x192xf32, #tpu.memory_space<vmem>>, %arg11: memref<32x192xf32, #tpu.memory_space<vmem>>, %arg12: memref<32x12xf32, #tpu.memory_space<vmem>>, %arg13: memref<192x12xf32, #tpu.memory_space<vmem>>, %arg14: memref<8x12xf32, #tpu.memory_space<vmem>>) attributes {dimension_semantics = [#tpu.dimension_semantics<parallel>], iteration_bounds = array<i64: 1>, scalar_prefetch = 0 : i64, scratch_operands = 0 : i64, tpu.core_type = #tpu.core_type<tc>, window_params = [{transform_indices = @transform_0, window_bounds = array<i64: 8, 8>}, {pipeline_mode = #tpu.pipeline_mode<synchronous>, transform_indices = @transform_1, window_bounds = array<i64: 8, 32>}, {pipeline_mode = #tpu.pipeline_mode<synchronous>, transform_indices = @transform_2, window_bounds = array<i64: 1, 32>}, {pipeline_mode = #tpu.pipeline_mode<synchronous>, transform_indices = @transform_3, window_bounds = array<i64: 32, 32>}, {pipeline_mode = #tpu.pipeline_mode<synchronous>, transform_indices = @transform_4, window_bounds = array<i64: 1, 32>}, {pipeline_mode = #tpu.pipeline_mode<synchronous>, transform_indices = @transform_5, window_bounds = array<i64: 32, 32>}, {pipeline_mode = #tpu.pipeline_mode<synchronous>, transform_indices = @transform_6, window_bounds = array<i64: 1, 32>}, {pipeline_mode = #tpu.pipeline_mode<synchronous>, transform_indices = @transform_7, window_bounds = array<i64: 32, 32>}, {pipeline_mode = #tpu.pipeline_mode<synchronous>, transform_indices = @transform_8, window_bounds = array<i64: 1, 32>}, {pipeline_mode = #tpu.pipeline_mode<synchronous>, transform_indices = @transform_9, window_bounds = array<i64: 32, 192>}, {pipeline_mode = #tpu.pipeline_mode<synchronous>, transform_indices = @transform_10, window_bounds = array<i64: 32, 192>}, {pipeline_mode = #tpu.pipeline_mode<synchronous>, transform_indices = @transform_11, window_bounds = array<i64: 32, 12>}, {pipeline_mode = #tpu.pipeline_mode<synchronous>, transform_indices = @transform_12, window_bounds = array<i64: 192, 12>}, {transform_indices = @transform_13, window_bounds = array<i64: 8, 12>}]} {
    %c0 = arith.constant 0 : index
    %c0_0 = arith.constant 0 : index
    %0 = vector.load %arg1[%c0, %c0_0] : memref<8x8xf32, #tpu.memory_space<vmem>>, vector<8x8xf32>
    %c0_1 = arith.constant 0 : index
    %c0_2 = arith.constant 0 : index
    %1 = vector.load %arg2[%c0_1, %c0_2] : memref<8x32xf32, #tpu.memory_space<vmem>>, vector<8x32xf32>
    %cst = arith.constant dense<0.000000e+00> : vector<8x32xf32>
    %2 = tpu.matmul %0, %1, %cst {dimension_numbers = #tpu.dot_dimension_numbers<[1], [0], [0], [1], [0, 0, 1, 1], [], []>} : vector<8x8xf32>, vector<8x32xf32>, vector<8x32xf32> -> vector<8x32xf32>
    %c0_3 = arith.constant 0 : index
    %c0_4 = arith.constant 0 : index
    %3 = vector.load %arg3[%c0_3, %c0_4] : memref<1x32xf32, #tpu.memory_space<vmem>>, vector<1x32xf32>
    %4 = vector.broadcast %3 : vector<1x32xf32> to vector<8x32xf32>
    %5 = arith.addf %2, %4 : vector<8x32xf32>
    %6 = math.tanh %5 : vector<8x32xf32>
    %c0_5 = arith.constant 0 : index
    %c0_6 = arith.constant 0 : index
    %7 = vector.load %arg4[%c0_5, %c0_6] : memref<32x32xf32, #tpu.memory_space<vmem>>, vector<32x32xf32>
    %cst_7 = arith.constant dense<0.000000e+00> : vector<8x32xf32>
    %8 = tpu.matmul %6, %7, %cst_7 {dimension_numbers = #tpu.dot_dimension_numbers<[1], [0], [0], [1], [0, 0, 1, 1], [], []>} : vector<8x32xf32>, vector<32x32xf32>, vector<8x32xf32> -> vector<8x32xf32>
    %c0_8 = arith.constant 0 : index
    %c0_9 = arith.constant 0 : index
    %9 = vector.load %arg5[%c0_8, %c0_9] : memref<1x32xf32, #tpu.memory_space<vmem>>, vector<1x32xf32>
    %10 = vector.broadcast %9 : vector<1x32xf32> to vector<8x32xf32>
    %11 = arith.addf %8, %10 : vector<8x32xf32>
    %12 = math.tanh %11 : vector<8x32xf32>
    %c0_10 = arith.constant 0 : index
    %c0_11 = arith.constant 0 : index
    %13 = vector.load %arg6[%c0_10, %c0_11] : memref<32x32xf32, #tpu.memory_space<vmem>>, vector<32x32xf32>
    %cst_12 = arith.constant dense<0.000000e+00> : vector<8x32xf32>
    %14 = tpu.matmul %12, %13, %cst_12 {dimension_numbers = #tpu.dot_dimension_numbers<[1], [0], [0], [1], [0, 0, 1, 1], [], []>} : vector<8x32xf32>, vector<32x32xf32>, vector<8x32xf32> -> vector<8x32xf32>
    %c0_13 = arith.constant 0 : index
    %c0_14 = arith.constant 0 : index
    %15 = vector.load %arg7[%c0_13, %c0_14] : memref<1x32xf32, #tpu.memory_space<vmem>>, vector<1x32xf32>
    %16 = vector.broadcast %15 : vector<1x32xf32> to vector<8x32xf32>
    %17 = arith.addf %14, %16 : vector<8x32xf32>
    %18 = math.tanh %17 : vector<8x32xf32>
    %c0_15 = arith.constant 0 : index
    %c0_16 = arith.constant 0 : index
    %19 = vector.load %arg8[%c0_15, %c0_16] : memref<32x32xf32, #tpu.memory_space<vmem>>, vector<32x32xf32>
    %cst_17 = arith.constant dense<0.000000e+00> : vector<8x32xf32>
    %20 = tpu.matmul %18, %19, %cst_17 {dimension_numbers = #tpu.dot_dimension_numbers<[1], [0], [0], [1], [0, 0, 1, 1], [], []>} : vector<8x32xf32>, vector<32x32xf32>, vector<8x32xf32> -> vector<8x32xf32>
    %c0_18 = arith.constant 0 : index
    %c0_19 = arith.constant 0 : index
    %21 = vector.load %arg9[%c0_18, %c0_19] : memref<1x32xf32, #tpu.memory_space<vmem>>, vector<1x32xf32>
    %22 = vector.broadcast %21 : vector<1x32xf32> to vector<8x32xf32>
    %23 = arith.addf %20, %22 : vector<8x32xf32>
    %c0_20 = arith.constant 0 : index
    %c0_21 = arith.constant 0 : index
    %24 = vector.load %arg10[%c0_20, %c0_21] : memref<32x192xf32, #tpu.memory_space<vmem>>, vector<32x192xf32>
    %cst_22 = arith.constant dense<0.000000e+00> : vector<8x192xf32>
    %25 = tpu.matmul %23, %24, %cst_22 {dimension_numbers = #tpu.dot_dimension_numbers<[1], [0], [0], [1], [0, 0, 1, 1], [], []>} : vector<8x32xf32>, vector<32x192xf32>, vector<8x192xf32> -> vector<8x192xf32>
    %c0_23 = arith.constant 0 : index
    %c0_24 = arith.constant 0 : index
    %26 = vector.load %arg11[%c0_23, %c0_24] : memref<32x192xf32, #tpu.memory_space<vmem>>, vector<32x192xf32>
    %cst_25 = arith.constant dense<0.000000e+00> : vector<8x192xf32>
    %27 = tpu.matmul %23, %26, %cst_25 {dimension_numbers = #tpu.dot_dimension_numbers<[1], [0], [0], [1], [0, 0, 1, 1], [], []>} : vector<8x32xf32>, vector<32x192xf32>, vector<8x192xf32> -> vector<8x192xf32>
    %c0_26 = arith.constant 0 : index
    %c0_27 = arith.constant 0 : index
    %28 = vector.load %arg12[%c0_26, %c0_27] : memref<32x12xf32, #tpu.memory_space<vmem>>, vector<32x12xf32>
    %cst_28 = arith.constant dense<0.000000e+00> : vector<8x12xf32>
    %29 = tpu.matmul %23, %28, %cst_28 {dimension_numbers = #tpu.dot_dimension_numbers<[1], [0], [0], [1], [0, 0, 1, 1], [], []>} : vector<8x32xf32>, vector<32x12xf32>, vector<8x12xf32> -> vector<8x12xf32>
    %30 = arith.mulf %25, %27 : vector<8x192xf32>
    %c0_29 = arith.constant 0 : index
    %c0_30 = arith.constant 0 : index
    %31 = vector.load %arg13[%c0_29, %c0_30] : memref<192x12xf32, #tpu.memory_space<vmem>>, vector<192x12xf32>
    %cst_31 = arith.constant dense<0.000000e+00> : vector<8x12xf32>
    %32 = tpu.matmul %30, %31, %cst_31 {dimension_numbers = #tpu.dot_dimension_numbers<[1], [0], [0], [1], [0, 0, 1, 1], [], []>} : vector<8x192xf32>, vector<192x12xf32>, vector<8x12xf32> -> vector<8x12xf32>
    %33 = arith.addf %29, %32 : vector<8x12xf32>
    %c0_32 = arith.constant 0 : index
    %c0_33 = arith.constant 0 : index
    %34 = vector.load %arg14[%c0_32, %c0_33] : memref<8x12xf32, #tpu.memory_space<vmem>>, vector<8x12xf32>
    tpu.vector_store %arg14[%c0_32, %c0_33], %33 {strides = array<i32>} : memref<8x12xf32, #tpu.memory_space<vmem>>, vector<8x12xf32>,
    return
  }
  func.func @transform_0(%arg0: i32) -> (i32, i32) {
    %c0_i32 = arith.constant 0 : i32
    %c0_i32_0 = arith.constant 0 : i32
    return %arg0, %c0_i32 : i32, i32
  }
  func.func @transform_1(%arg0: i32) -> (i32, i32) {
    %c0_i32 = arith.constant 0 : i32
    %c0_i32_0 = arith.constant 0 : i32
    %c0_i32_1 = arith.constant 0 : i32
    return %c0_i32, %c0_i32_0 : i32, i32
  }
  func.func @transform_2(%arg0: i32) -> (i32, i32) {
    %c0_i32 = arith.constant 0 : i32
    %c0_i32_0 = arith.constant 0 : i32
    %c0_i32_1 = arith.constant 0 : i32
    return %c0_i32, %c0_i32_0 : i32, i32
  }
  func.func @transform_3(%arg0: i32) -> (i32, i32) {
    %c0_i32 = arith.constant 0 : i32
    %c0_i32_0 = arith.constant 0 : i32
    %c0_i32_1 = arith.constant 0 : i32
    return %c0_i32, %c0_i32_0 : i32, i32
  }
  func.func @transform_4(%arg0: i32) -> (i32, i32) {
    %c0_i32 = arith.constant 0 : i32
    %c0_i32_0 = arith.constant 0 : i32
    %c0_i32_1 = arith.constant 0 : i32
    return %c0_i32, %c0_i32_0 : i32, i32
  }
  func.func @transform_5(%arg0: i32) -> (i32, i32) {
    %c0_i32 = arith.constant 0 : i32
    %c0_i32_0 = arith.constant 0 : i32
    %c0_i32_1 = arith.constant 0 : i32
    return %c0_i32, %c0_i32_0 : i32, i32
  }
  func.func @transform_6(%arg0: i32) -> (i32, i32) {
    %c0_i32 = arith.constant 0 : i32
    %c0_i32_0 = arith.constant 0 : i32
    %c0_i32_1 = arith.constant 0 : i32
    return %c0_i32, %c0_i32_0 : i32, i32
  }
  func.func @transform_7(%arg0: i32) -> (i32, i32) {
    %c0_i32 = arith.constant 0 : i32
    %c0_i32_0 = arith.constant 0 : i32
    %c0_i32_1 = arith.constant 0 : i32
    return %c0_i32, %c0_i32_0 : i32, i32
  }
  func.func @transform_8(%arg0: i32) -> (i32, i32) {
    %c0_i32 = arith.constant 0 : i32
    %c0_i32_0 = arith.constant 0 : i32
    %c0_i32_1 = arith.constant 0 : i32
    return %c0_i32, %c0_i32_0 : i32, i32
  }
  func.func @transform_9(%arg0: i32) -> (i32, i32) {
    %c0_i32 = arith.constant 0 : i32
    %c0_i32_0 = arith.constant 0 : i32
    %c0_i32_1 = arith.constant 0 : i32
    return %c0_i32, %c0_i32_0 : i32, i32
  }
  func.func @transform_10(%arg0: i32) -> (i32, i32) {
    %c0_i32 = arith.constant 0 : i32
    %c0_i32_0 = arith.constant 0 : i32
    %c0_i32_1 = arith.constant 0 : i32
    return %c0_i32, %c0_i32_0 : i32, i32
  }
  func.func @transform_11(%arg0: i32) -> (i32, i32) {
    %c0_i32 = arith.constant 0 : i32
    %c0_i32_0 = arith.constant 0 : i32
    %c0_i32_1 = arith.constant 0 : i32
    return %c0_i32, %c0_i32_0 : i32, i32
  }
  func.func @transform_12(%arg0: i32) -> (i32, i32) {
    %c0_i32 = arith.constant 0 : i32
    %c0_i32_0 = arith.constant 0 : i32
    %c0_i32_1 = arith.constant 0 : i32
    return %c0_i32, %c0_i32_0 : i32, i32
  }
  func.func @transform_13(%arg0: i32) -> (i32, i32) {
    %c0_i32 = arith.constant 0 : i32
    %c0_i32_0 = arith.constant 0 : i32
    return %arg0, %c0_i32 : i32, i32
  }
}

</mosaic_0001>

<bundles_post_ra>
// kernel: tpu_custom_call.1
= control target key start
LH: loop header
LB: loop body
LE: loop exit
PB: predicated region body
PF: predicated region fallthrough
CT: control target
= control target key end

     0   :  { %vm54_vm0 = vcmask 64512   ;;  %v849_v2 = vmov 0.0   ;;  %vm850_vm1 = vmmov 0   ;;  %s1170_s0 = inlined_call_operand.vmem [shape: f32[8,8], index: 0, kind: input, shape index: {}]   ;;  %s1171_s1 = inlined_call_operand.vmem [shape: f32[8,32], index: 1, kind: input, shape index: {}]   ;;  %s1172_s2 = inlined_call_operand.vmem [shape: f32[1,32], index: 2, kind: input, shape index: {}]   ;;  %s1173_s3 = inlined_call_operand.vmem [shape: f32[32,32], index: 3, kind: input, shape index: {}]   ;;  %s1174_s4 = inlined_call_operand.vmem [shape: f32[1,32], index: 4, kind: input, shape index: {}]   ;;  %s1175_s5 = inlined_call_operand.vmem [shape: f32[32,32], index: 5, kind: input, shape index: {}]   ;;  %s1176_s6 = inlined_call_operand.vmem [shape: f32[1,32], index: 6, kind: input, shape index: {}]   ;;  %s1177_s7 = inlined_call_operand.vmem [shape: f32[32,32], index: 7, kind: input, shape index: {}]   ;;  %s1178_s8 = inlined_call_operand.vmem [shape: f32[1,32], index: 8, kind: input, shape index: {}]   ;;  %s1179_s9 = inlined_call_operand.vmem [shape: f32[32,192], index: 9, kind: input, shape index: {}]   ;;  %s1180_s10 = inlined_call_operand.vmem [shape: f32[32,192], index: 10, kind: input, shape index: {}]   ;;  %s1181_s11 = inlined_call_operand.vmem [shape: f32[32,12], index: 11, kind: input, shape index: {}]   ;;  %s1182_s12 = inlined_call_operand.vmem [shape: f32[192,12], index: 12, kind: input, shape index: {}]   ;;  %s1183_s13 = inlined_call_operand.hbm [shape: f32[8,12], index: 13, kind: output, shape index: {}]  }
   0x1   :  { %v46_v0 = vld [vmem:[%s1171_s1] sm:$0xff]  ;;  %769 = vmatprep.subr.mxu0 %v849_v2  ;;  %771 = vmatprep.mubr.msk.f32.mxu0 %vm850_vm1, %v849_v2 }
   0x2   :  { %v45_v1 = vld [vmem:[%s1170_s0] sm:$0xff] }
   0x3   :  { %18 = vsyncpa [#allocation3], 0  ;;  %770 = vmatpush3.msra.mxu0 %v46_v0  ;;  %774 = vmatprep.subr.mxu1 %v849_v2  ;;  %v132_v3 = vld [vmem:[%s1173_s3 + $0x18] sm:$0xff]  ;;  %v131_v4 = vld [vmem:[%s1173_s3 + $0x10] sm:$0xff]  ;;  %vm140_vm2 = vcmask 261120   ;;  %vm575_vm3 = vcmask 523264  }
   0x4   :  { %772 = vmatmul.mubr.msk.f32.vlgmr.msra.gmra.mxu0 %vm54_vm0, %v45_v1  ;;  %782 = vmatprep.mubr.msk.f32.mxu1 %vm850_vm1, %v849_v2  ;;  %v130_v5 = vld [vmem:[%s1173_s3 + $0x8] sm:$0xff]  ;;  %v129_v6 = vld [vmem:[%s1173_s3] sm:$0xff]  ;;  %v218_v12 = vld [vmem:[%s1175_s5 + $0x18] sm:$0xff]  ;;  %vm719_vm4 = vcmask 97280  }
   0x5   :  { %579 = vmatprep.subr.mxu0 %v849_v2  ;;  %775 = vmatpush3.msra.mxu1 %v132_v3  ;;  %v735_v7 = vld [vmem:[%s1172_s2] ss:$0 sm:$0xff]  ;;  %v217_v13 = vld [vmem:[%s1175_s5 + $0x10] sm:$0xff]  ;;  %v216_v14 = vld [vmem:[%s1175_s5 + $0x8] sm:$0xff] }
   0x6   :  { %776 = vmatprep.subr.mxu1 %v849_v2  ;;  %v215_v15 = vld [vmem:[%s1175_s5] sm:$0xff]  ;;  %v303_v21 = vld [vmem:[%s1177_s7 + $0x18] sm:$0xff]  ;;  %v302_v22 = vld [vmem:[%s1177_s7 + $0x10] sm:$0xff] }
   0x7   :  { %777 = vmatpush3.msra.mxu1 %v131_v4  ;;  %v737_v16 = vld [vmem:[%s1174_s4] ss:$0 sm:$0xff]  ;;  %v301_v23 = vld [vmem:[%s1177_s7 + $0x8] sm:$0xff]  ;;  %v391_v25 = vld [vmem:[%s1179_s9 + $0x38] sm:$0xff] }
   0x8   :  { %778 = vmatprep.subr.mxu1 %v849_v2  ;;  %v300_v24 = vld [vmem:[%s1177_s7] sm:$0xff]  ;;  %v390_v30 = vld [vmem:[%s1179_s9 + $0x30] sm:$0xff]  ;;  %v389_v32 = vld [vmem:[%s1179_s9 + $0x28] sm:$0xff] }
   0x9   :  { %779 = vmatpush3.msra.mxu1 %v130_v5  ;;  %v739_v26 = vld [vmem:[%s1176_s6] ss:$0 sm:$0xff]  ;;  %v387_v34 = vld [vmem:[%s1179_s9 + $0x18] sm:$0xff]  ;;  %v386_v35 = vld [vmem:[%s1179_s9 + $0x10] sm:$0xff] }
   0xa   :  { %780 = vmatprep.subr.mxu1 %v849_v2  ;;  %v388_v33 = vld [vmem:[%s1179_s9 + $0x20] sm:$0xff]  ;;  %v385_v36 = vld [vmem:[%s1179_s9 + $0x8] sm:$0xff]  ;;  %v473_v38 = vld [vmem:[%s1180_s10 + $0x38] sm:$0xff] }
   0xb   :  { %781 = vmatpush3.msra.mxu1 %v129_v6  ;;  %v384_v37 = vld [vmem:[%s1179_s9] sm:$0xff]  ;;  %v566_v39 = vld [vmem:[%s1182_s12 + $0x78] sm:$0xff]  ;;  %v565_v40 = vld [vmem:[%s1182_s12 + $0x70] sm:$0xff] }
   0xc   :  { %785 = vmatprep.subr.mxu1 %v849_v2  ;;  %580 = vmatpush1.msra.mxu0 %v566_v39  ;;  %v564_v41 = vld [vmem:[%s1182_s12 + $0x68] sm:$0xff]  ;;  %v563_v42 = vld [vmem:[%s1182_s12 + $0x60] sm:$0xff]  ;;  %v562_v43 = vld [vmem:[%s1182_s12 + $0x58] sm:$0xff] }
   0xd   :  { %581 = vmatprep.subr.mxu0 %v849_v2  ;;  %v561_v44 = vld [vmem:[%s1182_s12 + $0x50] sm:$0xff]  ;;  %v560_v45 = vld [vmem:[%s1182_s12 + $0x48] sm:$0xff]  ;;  %v559_v46 = vld [vmem:[%s1182_s12 + $0x40] sm:$0xff] }
   0xe   :  { %582 = vmatpush1.msra.mxu0 %v565_v40  ;;  %v558_v47 = vld [vmem:[%s1182_s12 + $0x38] sm:$0xff]  ;;  %v557_v48 = vld [vmem:[%s1182_s12 + $0x30] sm:$0xff]  ;;  %v556_v49 = vld [vmem:[%s1182_s12 + $0x28] sm:$0xff] }
   0xf   :  { %583 = vmatprep.subr.mxu0 %v849_v2  ;;  %v555_v50 = vld [vmem:[%s1182_s12 + $0x20] sm:$0xff]  ;;  %v554_v51 = vld [vmem:[%s1182_s12 + $0x18] sm:$0xff]  ;;  %v553_v52 = vld [vmem:[%s1182_s12 + $0x10] sm:$0xff] }
  0x10   :  { %584 = vmatpush1.msra.mxu0 %v564_v41  ;;  %v552_v53 = vld [vmem:[%s1182_s12 + $0x8] sm:$0xff]  ;;  %v551_v54 = vld [vmem:[%s1182_s12] sm:$0xff]  ;;  %v574_v55 = vld [vmem:[%s1182_s12 + $0xb8] sm:$0xff] }
  0x11   :  { %585 = vmatprep.subr.mxu0 %v849_v2  ;;  %v741_v56 = vld [vmem:[%s1178_s8] ss:$0 sm:$0xff]  ;;  %v472_v59 = vld [vmem:[%s1180_s10 + $0x30] sm:$0xff]  ;;  %v471_v61 = vld [vmem:[%s1180_s10 + $0x28] sm:$0xff]  ;;  %s851_s8 = smov [#allocation2]  }
  0x12   :  { %586 = vmatpush1.msra.mxu0 %v563_v42  ;;  %v470_v62 = vld [vmem:[%s1180_s10 + $0x20] sm:$0xff]  ;;  %v469_v63 = vld [vmem:[%s1180_s10 + $0x18] sm:$0xff]  ;;  %v468_v0 = vld [vmem:[%s1180_s10 + $0x10] sm:$0xff]  ;;  %s727_s2 = sshll.u32 %s851_s8, 4  ;;  %s728_s2 = int_to_ptr.vmem [resolvable:$true] %s727_s2 }
  0x13   :  { %587 = vmatprep.subr.mxu0 %v849_v2  ;;  %v467_v1 = vld [vmem:[%s1180_s10 + $0x8] sm:$0xff]  ;;  %v466_v3 = vld [vmem:[%s1180_s10] sm:$0xff]  ;;  %v548_v4 = vld [vmem:[%s1181_s11 + $0x18] sm:$0xff]  ;;  %p832_p1 = scmp.lt.s32.totalorder %s728_s2, %s728_s2 }
  0x14   :  { %588 = vmatpush1.msra.mxu0 %v562_v43  ;;  %v547_v5 = vld [vmem:[%s1181_s11 + $0x10] sm:$0xff]  ;;  %v546_v6 = vld [vmem:[%s1181_s11 + $0x8] sm:$0xff] }
  0x15   :  { %589 = vmatprep.subr.mxu0 %v849_v2 }
  0x16   :  { %590 = vmatpush1.msra.mxu0 %v561_v44 }
  0x17   :  { %591 = vmatprep.subr.mxu0 %v849_v2 }
  0x18   :  { %592 = vmatpush1.msra.mxu0 %v560_v45 }
  0x19   :  { %593 = vmatprep.subr.mxu0 %v849_v2 }
  0x1a   :  { %594 = vmatpush1.msra.mxu0 %v559_v46 }
  0x1b   :  { %595 = vmatprep.subr.mxu0 %v849_v2 }
  0x1c   :  { %596 = vmatpush1.msra.mxu0 %v558_v47 }
  0x1d   :  { %597 = vmatprep.subr.mxu0 %v849_v2 }
  0x1e   :  { %598 = vmatpush1.msra.mxu0 %v557_v48 }
  0x1f   :  { %599 = vmatprep.subr.mxu0 %v849_v2 }
  0x20   :  { %600 = vmatpush1.msra.mxu0 %v556_v49 }
  0x21   :  { %601 = vmatprep.subr.mxu0 %v849_v2 }
  0x22   :  { %602 = vmatpush1.msra.mxu0 %v555_v50 }
  0x23   :  { %603 = vmatprep.subr.mxu0 %v849_v2 }
  0x24   :  { %604 = vmatpush1.msra.mxu0 %v554_v51 }
  0x25   :  { %605 = vmatprep.subr.mxu0 %v849_v2 }
  0x26   :  { %606 = vmatpush1.msra.mxu0 %v553_v52 }
  0x27   :  { %607 = vmatprep.subr.mxu0 %v849_v2 }
  0x28   :  { %608 = vmatpush1.msra.mxu0 %v552_v53 }
  0x29   :  { %609 = vmatprep.subr.mxu0 %v849_v2 }
  0x2a   :  { %610 = vmatpush1.msra.mxu0 %v551_v54 }
  0x2b   :  { %627 = vmatprep.subr.mxu0 %v849_v2 }
  0x2c   :  { %628 = vmatpush2.msra.mxu0 %v574_v55 }
  0x2d   :  { %629 = vmatprep.subr.mxu0 %v849_v2 }
  0xc4   :  { %v124_v8 = vpop.f32.mrf.mxu0 }
  0xc5   :  { %v125_v9 = vadd.f32 %v735_v7, %v124_v8  ;;  %v545_v7 = vld [vmem:[%s1181_s11] sm:$0xff]  ;;  %v573_v8 = vld [vmem:[%s1182_s12 + $0xb0] sm:$0xff] }
  0xc6   :  { %v773_v10 = vpop.f32.mrf.mxu0  ;;  %630 = vmatpush2.msra.mxu0 %v573_v8 }
  0xc7   :  { %821 = vtanh.f32 %v125_v9  ;;  %631 = vmatprep.subr.mxu0 %v849_v2  ;;  %v572_v9 = vld [vmem:[%s1182_s12 + $0xa8] sm:$0xff]  ;;  %v571_v10 = vld [vmem:[%s1182_s12 + $0xa0] sm:$0xff] }
  0xc8   :  { %632 = vmatpush2.msra.mxu0 %v572_v9 }
  0xc9   :  { %633 = vmatprep.subr.mxu0 %v849_v2 }
  0xca   :  { %634 = vmatpush2.msra.mxu0 %v571_v10 }
  0xcb   :  { %635 = vmatprep.subr.mxu0 %v849_v2 }
  0xd4   :  { %v822_v11 = vpop.eup %821 }
  0xd5   :  { %783 = vmatmul.mubr.msk.f32.vlgmr.msra.gmra.mxu1 %vm140_vm2, %v822_v11  ;;  %v570_v11 = vld [vmem:[%s1182_s12 + $0x98] sm:$0xff] }
  0xd6   :  { %793 = vmatprep.mubr.msk.f32.mxu1 %vm850_vm1, %v849_v2  ;;  %786 = vmatpush3.msra.mxu1 %v218_v12  ;;  %v569_v12 = vld [vmem:[%s1182_s12 + $0x90] sm:$0xff] }
  0xd7   :  { %787 = vmatprep.subr.mxu1 %v849_v2  ;;  %636 = vmatpush2.msra.mxu0 %v570_v11 }
  0xd8   :  { %788 = vmatpush3.msra.mxu1 %v217_v13  ;;  %637 = vmatprep.subr.mxu0 %v849_v2  ;;  %v568_v13 = vld [vmem:[%s1182_s12 + $0x88] sm:$0xff] }
  0xd9   :  { %789 = vmatprep.subr.mxu1 %v849_v2  ;;  %638 = vmatpush2.msra.mxu0 %v569_v12 }
  0xda   :  { %790 = vmatpush3.msra.mxu1 %v216_v14  ;;  %639 = vmatprep.subr.mxu0 %v849_v2  ;;  %v567_v14 = vld [vmem:[%s1182_s12 + $0x80] sm:$0xff]  ;;  %s827_s12 = scalar_lea.vmem %s728_s2, 128 }
  0xdb   :  { %791 = vmatprep.subr.mxu1 %v849_v2  ;;  %640 = vmatpush2.msra.mxu0 %v568_v13  ;;  %p828_p0 = scmp.ne.s32.totalorder %s728_s2, %s827_s12  ;;  %p833_p2 = scmp.lt.s32.totalorder %s827_s12, %s827_s12 }
  0xdc   :  { %792 = vmatpush3.msra.mxu1 %v215_v15  ;;  %641 = vmatprep.subr.mxu0 %v849_v2 }
  0xdd   :  { %796 = vmatprep.subr.mxu1 %v849_v2  ;;  %642 = vmatpush2.msra.mxu0 %v567_v14  ;;  %p834_p3 = por %p833_p2, %p832_p1 }
  0xdf   :  { %p835_p4 = pnand %p834_p3, %p828_p0 }
 0x195   :  { %v210_v17 = vpop.f32.mrf.mxu1 }
 0x196   :  { %v211_v18 = vadd.f32 %v737_v16, %v210_v17 }
 0x197   :  { %v784_v19 = vpop.f32.mrf.mxu1 }
 0x198   :  { %823 = vtanh.f32 %v211_v18 }
 0x1a5   :  { %v824_v20 = vpop.eup %823 }
 0x1a6   :  { %794 = vmatmul.mubr.msk.f32.vlgmr.msra.gmra.mxu1 %vm140_vm2, %v824_v20 }
 0x1a7   :  { %804 = vmatprep.mubr.msk.f32.mxu1 %vm850_vm1, %v849_v2  ;;  %797 = vmatpush3.msra.mxu1 %v303_v21 }
 0x1a8   :  { %798 = vmatprep.subr.mxu1 %v849_v2 }
 0x1a9   :  { %799 = vmatpush3.msra.mxu1 %v302_v22 }
 0x1aa   :  { %800 = vmatprep.subr.mxu1 %v849_v2 }
 0x1ab   :  { %801 = vmatpush3.msra.mxu1 %v301_v23 }
 0x1ac   :  { %802 = vmatprep.subr.mxu1 %v849_v2 }
 0x1ad   :  { %803 = vmatpush3.msra.mxu1 %v300_v24 }
 0x1ae   :  { %419 = vmatprep.subr.mxu1 %v391_v25 }
 0x266   :  { %v295_v27 = vpop.f32.mrf.mxu1 }
 0x267   :  { %v296_v28 = vadd.f32 %v739_v26, %v295_v27 }
 0x268   :  { %v795_v29 = vpop.f32.mrf.mxu1 }
 0x269   :  { %825 = vtanh.f32 %v296_v28 }
 0x276   :  { %v826_v31 = vpop.eup %825 }
 0x277   :  { %805 = vmatmul.mubr.msk.f32.vlgmr.msra.gmra.mxu1 %vm140_vm2, %v826_v31 }
 0x278   :  { %420 = vmatpush1.msra.mxu1 %v390_v30  ;;  %459 = vmatprep.mubr.f32.mxu1 %v849_v2 }
 0x279   :  { %421 = vmatprep.subr.mxu1 %v389_v32 }
 0x27a   :  { %422 = vmatpush1.msra.mxu1 %v388_v33 }
 0x27b   :  { %423 = vmatprep.subr.mxu1 %v387_v34 }
 0x27c   :  { %424 = vmatpush1.msra.mxu1 %v386_v35 }
 0x27d   :  { %425 = vmatprep.subr.mxu1 %v385_v36 }
 0x27e   :  { %426 = vmatpush1.msra.mxu1 %v384_v37 }
 0x27f   :  { %498 = vmatprep.subr.mxu1 %v473_v38 }
 0x337   :  { %v380_v57 = vpop.f32.mrf.mxu1 }
 0x338   :  { %v381_v58 = vadd.f32 %v741_v56, %v380_v57 }
 0x339   :  { %v806_v60 = vpop.f32.mrf.mxu1 }
 0x33a   :  { %743 = vmatmul.mubr.msk.f32.vlgmr.msra.gmra.mxu1 %vm140_vm2, %v381_v58 }
 0x33b   :  { %499 = vmatpush1.msra.mxu1 %v472_v59  ;;  %538 = vmatprep.mubr.f32.mxu1 %v849_v2 }
 0x33c   :  { %500 = vmatprep.subr.mxu1 %v471_v61 }
 0x33d   :  { %501 = vmatpush1.msra.mxu1 %v470_v62 }
 0x33e   :  { %502 = vmatprep.subr.mxu1 %v469_v63 }
 0x33f   :  { %503 = vmatpush1.msra.mxu1 %v468_v0 }
 0x340   :  { %504 = vmatprep.subr.mxu1 %v467_v1 }
 0x341   :  { %505 = vmatpush1.msra.mxu1 %v466_v3 }
 0x342   :  { %744 = vmatmul.mubr.msk.f32.vlgmr.msra.gmra.mxu1 %vm140_vm2, %v381_v58  ;;  %807 = vmatprep.subr.mxu1 %v849_v2 }
 0x343   :  { %808 = vmatpush3.msra.mxu1 %v548_v4  ;;  %815 = vmatprep.mubr.msk.f32.mxu1 %vm850_vm1, %v849_v2 }
 0x344   :  { %809 = vmatprep.subr.mxu1 %v849_v2 }
 0x345   :  { %810 = vmatpush3.msra.mxu1 %v547_v5 }
 0x346   :  { %811 = vmatprep.subr.mxu1 %v849_v2 }
 0x347   :  { %812 = vmatpush3.msra.mxu1 %v546_v6 }
 0x348   :  { %813 = vmatprep.subr.mxu1 %v849_v2 }
 0x349   :  { %814 = vmatpush3.msra.mxu1 %v545_v7 }
 0x34a   :  { %816 = vmatmul.mubr.msk.f32.vlgmr.msra.gmra.mxu1 %vm140_vm2, %v381_v58 }
 0x3fa   :  { %v461_v15 = vpop.f32.mrf.mxu1 }
 0x3fc   :  { %v463_v16 = vpop.f32.mrf.mxu1 }
 0x402   :  { %v540_v17 = vpop.f32.mrf.mxu1 }
 0x403   :  { %v549_v20 = vmul.f32 %v540_v17, %v461_v15 }
 0x404   :  { %v542_v18 = vpop.f32.mrf.mxu1 }
 0x405   :  { %v550_v19 = vmul.f32 %v542_v18, %v463_v16 }
 0x407   :  { %745 = vmatprep.mubr.msk.f32.mxu0 %vm575_vm3, %v550_v19 }
 0x408   :  { %644 = vmatmul.mubr.f32.vlgmr.msra.gmra.mxu0 %v549_v20 }
 0x40a   :  { %v715_v21 = vpop.f32.mrf.mxu1 }
 0x40c   :  { %v817_v22 = vpop.f32.mrf.mxu1 }
 0x4c8   :  { %v645_v23 = vpop.f32.mrf.mxu0 }
 0x4c9   :  { %v716_v24 = vadd.f32 %v715_v21, %v645_v23 }
 0x4ca   :  { %v647_v25 = vpop.f32.mrf.mxu0 }
 0x4cb   :  { %720 = vst.msk [vmem:[#allocation2] sm:$0xff] %vm719_vm4, %v716_v24 }
 0x4cc   :  { %838 = shalt.err (!%p835_p4)
}
 0x4cd   :  { %730 = dma.vmem_to_hbm [thread:$0]  %s728_s2, 128, %s1183_s13, [#allocation3]  }
 0x4ce   :  { %847 = dma.done.wait [#allocation3], 128  }
 0x4cf   :  { %848 = vsyncadd [#allocation3], 4294967168 }
 0x4d0   :  { %734 = vsyncpa [#allocation3], 1 }

</bundles_post_ra>
